<compile_context>
chip_gen: v5e
topology: v5e:2x2
jax: 0.10.0
libtpu: 0.0.40
codegen_flags: <defaults>
</compile_context>

<pallas_src>
import numpy as np
import jax
import jax.numpy as jnp
from jax.experimental import pallas as pl
from jax.experimental.pallas import tpu as pltpu

BN_EPS = 1e-5
C_PAD = 128   # lane width for activations / weight output dims


# ----------------------------- Pallas kernel ------------------------------ #
def make_fused_resgcn_kernel(flags, out_c):
    """Fused multi-layer kernel.

    flags[i] == True  -> layer i residual is a matmul; params are
                         (wcat [K, 2*C_PAD] bf16, bias [1, C_PAD] f32) and the
                         concatenated RHS gives xw / res in one MXU push.
    flags[i] == False -> identity residual folded into an elementwise
                         per-channel BN scale; params are
                         (w [K, C_PAD] bf16, scale [1, C_PAD] f32, bias f32).
    Ref order: (a, x, <per-layer params...>, o).
    """

    def kernel(*refs):
        a_ref, x_ref = refs[0], refs[1]
        o_ref = refs[-1]
        p = refs[2:-1]

        a = a_ref[...]                              # [N, N] bf16, VMEM-resident all layers
        x = x_ref[...].astype(jnp.float32)          # activation kept f32 for the epilogue
        i = 0
        for has_proj in flags:
            if has_proj:
                wcat = p[i][...]; bias = p[i + 1][...]; i += 2
                y = jnp.dot(x.astype(jnp.bfloat16), wcat,
                            preferred_element_type=jnp.float32)   # one 256-lane MXU push
                xw, res = y[:, :C_PAD], y[:, C_PAD:]              # 128-aligned slices
            else:
                w = p[i][...]; scale = p[i + 1][...]; bias = p[i + 2][...]; i += 3
                xw = jnp.dot(x.astype(jnp.bfloat16), w,
                             preferred_element_type=jnp.float32)
                res = x * scale                                   # identity residual * BN scale
            agg = jnp.dot(a, xw.astype(jnp.bfloat16),
                          preferred_element_type=jnp.float32)
            x = jnp.maximum(agg + res + bias, 0.0)                # BN-folded bias + ReLU (f32 VPU)
        o_ref[...] = x[:, :out_c]                                 # slice inside the kernel

    return kernel


# --------------------- one-time host-side parameter prep ------------------ #
def prepare_params(layer_params):
    """Run ONCE (outside the per-call jit path).

    Folds eval-mode BatchNorm + both biases into the layer weights:
        s = gamma * rsqrt(var + eps),  W' = W*s,  Wr' = Wr*s,
        bias' = (b + br - mean)*s + beta,
    concatenates W'||Wr' along the output-lane axis for projection-residual
    layers, zero-pads channel dims, and casts matmul operands to bf16.
    Returns (flat_param_list, flags)."""
    flat, flags = [], []
    for li, p in enumerate(layer_params):
        cin, cout = p["w"].shape
        s = p["gamma"] * jax.lax.rsqrt(p["var"] + BN_EPS)            # [1, cout]
        w_f = p["w"] * s
        bias_f = (p["b"] + p["br"] - p["mean"]) * s + p["beta"]
        # first layer contracts the real input width (x arrives un-padded);
        # later layers contract the C_PAD-wide resident activation.
        k = cin if li == 0 else C_PAD
        bias_pad = jnp.zeros((1, C_PAD), jnp.float32).at[:, :cout].set(bias_f)
        # identity-residual elementwise form needs a C_PAD-wide activation,
        # so a (hypothetical) first identity layer falls back to the matmul form.
        use_mm = (cin != cout) or (li == 0 and cin != C_PAD)
        if use_mm:
            wr_f = p["wr"] * s                                       # wr is eye for identity
            wcat = (jnp.zeros((k, 2 * C_PAD), jnp.float32)
                    .at[:cin, :cout].set(w_f)
                    .at[:cin, C_PAD:C_PAD + cout].set(wr_f))
            flat += [wcat.astype(jnp.bfloat16), bias_pad]
        else:
            w_pad = jnp.zeros((k, C_PAD), jnp.float32).at[:cin, :cout].set(w_f)
            scale_pad = jnp.zeros((1, C_PAD), jnp.float32).at[:, :cout].set(s)
            flat += [w_pad.astype(jnp.bfloat16), scale_pad, bias_pad]
        flags.append(use_mm)
    return [jax.device_put(t) for t in flat], tuple(flags)


def _estimate_cost(n, in_c, out_c, flags, flat_params):
    flops = 0
    for t in flat_params:
        if t.ndim == 2 and t.shape[0] > 1:               # weight matrices (X @ W[cat])
            flops += 2 * n * t.shape[0] * t.shape[1]
    flops += 2 * n * n * C_PAD * len(flags)              # A @ (X W') per layer
    bytes_accessed = n * n * 2 + n * in_c * 4 + n * out_c * 4
    bytes_accessed += sum(int(t.size) * t.dtype.itemsize for t in flat_params)
    return pl.CostEstimate(flops=flops, transcendentals=0,
                           bytes_accessed=bytes_accessed)


def make_resgcn_forward(n, in_c, out_c, flags, flat_params):
    """Build the jitted fused forward: forward(a_bf16, x, *flat_params)."""
    kernel = make_fused_resgcn_kernel(flags, out_c)
    cost = _estimate_cost(n, in_c, out_c, flags, flat_params)
    vspec = pl.BlockSpec(memory_space=pltpu.MemorySpace.VMEM)
    call = pl.pallas_call(
        kernel,
        out_shape=jax.ShapeDtypeStruct((n, out_c), jnp.float32),
        in_specs=[vspec] * (2 + len(flat_params)),
        out_specs=vspec,
        cost_estimate=cost,
    )

    @jax.jit
    def forward(a_bf16, x, *params):
        return call(a_bf16, x, *params)

    return forward


# ------------------------------- host glue -------------------------------- #
def build_norm_adj(edge_index, num_nodes):
    """Dense D^{-1/2}(A+I)D^{-1/2}, reproducing GCNLayer edge filtering +
    PyG GCNConv gcn_norm (add_remaining_self_loops, in-degree norm).
    Duplicate edges accumulate as multi-edges, matching PyG's uncoalesced
    scatter-add message passing."""
    ei = np.asarray(edge_index)
    if ei.size > 0:
        valid = (ei[0] >= 0) & (ei[0] < num_nodes) & (ei[1] >= 0) & (ei[1] < num_nodes)
        ei = ei[:, valid]
    if ei.size == 0:
        ei = np.stack([np.arange(num_nodes), np.arange(num_nodes)])
    # (GCNLayer's extra self-loops for isolated nodes are subsumed by
    #  GCNConv's add_remaining_self_loops below.)
    mask = ei[0] != ei[1]
    row, col = ei[0][mask], ei[1][mask]
    a = np.zeros((num_nodes, num_nodes), np.float32)
    np.add.at(a, (col, row), 1.0)                 # message: source row -> target col
    a += np.eye(num_nodes, dtype=np.float32)      # exactly one self loop per node
    deg = a.sum(axis=1)                           # in-degree incl. self loop
    dinv = 1.0 / np.sqrt(deg)
    dinv[~np.isfinite(dinv)] = 0.0
    return (dinv[:, None] * a) * dinv[None, :]


def init_resgcn_params(key, in_c, hid_c, out_c, num_layers=3):
    dims = [in_c] + [hid_c] * (num_layers - 1) + [out_c]
    params = []
    for li in range(num_layers):
        cin, cout = dims[li], dims[li + 1]
        key, kw, kb, kr, krb = jax.random.split(key, 5)
        w = 0.1 * jax.random.normal(kw, (cin, cout), jnp.float32)   # GCNConv weight
        b = 0.01 * jax.random.normal(kb, (1, cout), jnp.float32)    # GCNConv bias
        if cin != cout:  # residual projection nn.Linear(cin, cout)
            wr = 0.1 * jax.random.normal(kr, (cin, cout), jnp.float32)
            br = 0.01 * jax.random.normal(krb, (1, cout), jnp.float32)
        else:            # identity residual
            wr = jnp.eye(cin, dtype=jnp.float32)
            br = jnp.zeros((1, cout), jnp.float32)
        params.append(dict(
            w=w, b=b, wr=wr, br=br,
            gamma=jnp.ones((1, cout), jnp.float32),   # BatchNorm1d default init
            beta=jnp.zeros((1, cout), jnp.float32),
            mean=jnp.zeros((1, cout), jnp.float32),
            var=jnp.ones((1, cout), jnp.float32),
        ))
    return params


def resgcn_ref(a_norm, x, layer_params):
    """Pure-JAX unfused / unfolded / unpadded f32 reference for correctness."""
    for p in layer_params:
        out = a_norm @ (x @ p["w"]) + p["b"] + x @ p["wr"] + p["br"]
        out = (out - p["mean"]) * jax.lax.rsqrt(p["var"] + BN_EPS) * p["gamma"] + p["beta"]
        x = jnp.maximum(out, 0.0)
    return x


if __name__ == "__main__":
    key = jax.random.PRNGKey(0)
    N, E = 64, 256                      # nodes, edges
    in_c, hid_c, out_c = 16, 32, 8
    k_x, k_e, k_p = jax.random.split(key, 3)

    x = jax.random.normal(k_x, (N, in_c), jnp.float32)          # [N, in_channels]
    edge_index = jax.random.randint(k_e, (2, E), 0, N)          # [2, E]

    a_norm_np = build_norm_adj(np.asarray(edge_index), N)
    params = init_resgcn_params(k_p, in_c, hid_c, out_c, num_layers=3)

    # --- one-time prep, hoisted out of the per-call path ---
    a_bf16 = jnp.asarray(a_norm_np, dtype=jnp.bfloat16)
    flat_params, flags = prepare_params(params)
    forward = make_resgcn_forward(N, in_c, out_c, flags, flat_params)

    y = forward(a_bf16, x, *flat_params)
    y = jax.block_until_ready(y)

    y_ref = resgcn_ref(jnp.asarray(a_norm_np), x, params)
    assert y.shape == (N, out_c)
    # bf16 MXU operands vs f32 reference -> relaxed tolerance
    assert np.allclose(np.asarray(y), np.asarray(y_ref), atol=5e-2, rtol=5e-2)
    print("KERNEL_OK")
</pallas_src>

<mosaic_0001>
module attributes {stable_mosaic.version = 11 : i64} {
  func.func @kernel(%arg0: memref<64x64xbf16, #tpu.memory_space<vmem>>, %arg1: memref<64x16xf32, #tpu.memory_space<vmem>>, %arg2: memref<16x256xbf16, #tpu.memory_space<vmem>>, %arg3: memref<1x128xf32, #tpu.memory_space<vmem>>, %arg4: memref<128x128xbf16, #tpu.memory_space<vmem>>, %arg5: memref<1x128xf32, #tpu.memory_space<vmem>>, %arg6: memref<1x128xf32, #tpu.memory_space<vmem>>, %arg7: memref<128x256xbf16, #tpu.memory_space<vmem>>, %arg8: memref<1x128xf32, #tpu.memory_space<vmem>>, %arg9: memref<64x8xf32, #tpu.memory_space<vmem>>) attributes {dimension_semantics = [], scalar_prefetch = 0 : i64, scratch_operands = 0 : i64, tpu.core_type = #tpu.core_type<tc>} {
    %c0 = arith.constant 0 : index
    %c0_0 = arith.constant 0 : index
    %0 = vector.load %arg0[%c0, %c0_0] : memref<64x64xbf16, #tpu.memory_space<vmem>>, vector<64x64xbf16>
    %c0_1 = arith.constant 0 : index
    %c0_2 = arith.constant 0 : index
    %1 = vector.load %arg1[%c0_1, %c0_2] : memref<64x16xf32, #tpu.memory_space<vmem>>, vector<64x16xf32>
    %c0_3 = arith.constant 0 : index
    %c0_4 = arith.constant 0 : index
    %2 = vector.load %arg2[%c0_3, %c0_4] : memref<16x256xbf16, #tpu.memory_space<vmem>>, vector<16x256xbf16>
    %c0_5 = arith.constant 0 : index
    %c0_6 = arith.constant 0 : index
    %3 = vector.load %arg3[%c0_5, %c0_6] : memref<1x128xf32, #tpu.memory_space<vmem>>, vector<1x128xf32>
    %4 = arith.truncf %1 : vector<64x16xf32> to vector<64x16xbf16>
    %cst = arith.constant dense<0.000000e+00> : vector<64x256xf32>
    %5 = tpu.matmul %4, %2, %cst {dimension_numbers = #tpu.dot_dimension_numbers<[1], [0], [0], [1], [0, 0, 1, 1], [], []>} : vector<64x16xbf16>, vector<16x256xbf16>, vector<64x256xf32> -> vector<64x256xf32>
    %6 = vector.extract_strided_slice %5 {offsets = [0, 0], sizes = [64, 128], strides = [1, 1]} : vector<64x256xf32> to vector<64x128xf32>
    %7 = vector.extract_strided_slice %5 {offsets = [0, 128], sizes = [64, 128], strides = [1, 1]} : vector<64x256xf32> to vector<64x128xf32>
    %8 = arith.truncf %6 : vector<64x128xf32> to vector<64x128xbf16>
    %cst_7 = arith.constant dense<0.000000e+00> : vector<64x128xf32>
    %9 = tpu.matmul %0, %8, %cst_7 {dimension_numbers = #tpu.dot_dimension_numbers<[1], [0], [0], [1], [0, 0, 1, 1], [], []>} : vector<64x64xbf16>, vector<64x128xbf16>, vector<64x128xf32> -> vector<64x128xf32>
    %10 = arith.addf %9, %7 : vector<64x128xf32>
    %11 = vector.broadcast %3 : vector<1x128xf32> to vector<64x128xf32>
    %12 = arith.addf %10, %11 : vector<64x128xf32>
    %cst_8 = arith.constant 0.000000e+00 : f32
    %13 = vector.broadcast %cst_8 : f32 to vector<64x128xf32>
    %14 = arith.maximumf %12, %13 : vector<64x128xf32>
    %c0_9 = arith.constant 0 : index
    %c0_10 = arith.constant 0 : index
    %15 = vector.load %arg4[%c0_9, %c0_10] : memref<128x128xbf16, #tpu.memory_space<vmem>>, vector<128x128xbf16>
    %c0_11 = arith.constant 0 : index
    %c0_12 = arith.constant 0 : index
    %16 = vector.load %arg5[%c0_11, %c0_12] : memref<1x128xf32, #tpu.memory_space<vmem>>, vector<1x128xf32>
    %c0_13 = arith.constant 0 : index
    %c0_14 = arith.constant 0 : index
    %17 = vector.load %arg6[%c0_13, %c0_14] : memref<1x128xf32, #tpu.memory_space<vmem>>, vector<1x128xf32>
    %18 = arith.truncf %14 : vector<64x128xf32> to vector<64x128xbf16>
    %cst_15 = arith.constant dense<0.000000e+00> : vector<64x128xf32>
    %19 = tpu.matmul %18, %15, %cst_15 {dimension_numbers = #tpu.dot_dimension_numbers<[1], [0], [0], [1], [0, 0, 1, 1], [], []>} : vector<64x128xbf16>, vector<128x128xbf16>, vector<64x128xf32> -> vector<64x128xf32>
    %20 = vector.broadcast %16 : vector<1x128xf32> to vector<64x128xf32>
    %21 = arith.mulf %14, %20 : vector<64x128xf32>
    %22 = arith.truncf %19 : vector<64x128xf32> to vector<64x128xbf16>
    %cst_16 = arith.constant dense<0.000000e+00> : vector<64x128xf32>
    %23 = tpu.matmul %0, %22, %cst_16 {dimension_numbers = #tpu.dot_dimension_numbers<[1], [0], [0], [1], [0, 0, 1, 1], [], []>} : vector<64x64xbf16>, vector<64x128xbf16>, vector<64x128xf32> -> vector<64x128xf32>
    %24 = arith.addf %23, %21 : vector<64x128xf32>
    %25 = vector.broadcast %17 : vector<1x128xf32> to vector<64x128xf32>
    %26 = arith.addf %24, %25 : vector<64x128xf32>
    %cst_17 = arith.constant 0.000000e+00 : f32
    %27 = vector.broadcast %cst_17 : f32 to vector<64x128xf32>
    %28 = arith.maximumf %26, %27 : vector<64x128xf32>
    %c0_18 = arith.constant 0 : index
    %c0_19 = arith.constant 0 : index
    %29 = vector.load %arg7[%c0_18, %c0_19] : memref<128x256xbf16, #tpu.memory_space<vmem>>, vector<128x256xbf16>
    %c0_20 = arith.constant 0 : index
    %c0_21 = arith.constant 0 : index
    %30 = vector.load %arg8[%c0_20, %c0_21] : memref<1x128xf32, #tpu.memory_space<vmem>>, vector<1x128xf32>
    %31 = arith.truncf %28 : vector<64x128xf32> to vector<64x128xbf16>
    %cst_22 = arith.constant dense<0.000000e+00> : vector<64x256xf32>
    %32 = tpu.matmul %31, %29, %cst_22 {dimension_numbers = #tpu.dot_dimension_numbers<[1], [0], [0], [1], [0, 0, 1, 1], [], []>} : vector<64x128xbf16>, vector<128x256xbf16>, vector<64x256xf32> -> vector<64x256xf32>
    %33 = vector.extract_strided_slice %32 {offsets = [0, 0], sizes = [64, 128], strides = [1, 1]} : vector<64x256xf32> to vector<64x128xf32>
    %34 = vector.extract_strided_slice %32 {offsets = [0, 128], sizes = [64, 128], strides = [1, 1]} : vector<64x256xf32> to vector<64x128xf32>
    %35 = arith.truncf %33 : vector<64x128xf32> to vector<64x128xbf16>
    %cst_23 = arith.constant dense<0.000000e+00> : vector<64x128xf32>
    %36 = tpu.matmul %0, %35, %cst_23 {dimension_numbers = #tpu.dot_dimension_numbers<[1], [0], [0], [1], [0, 0, 1, 1], [], []>} : vector<64x64xbf16>, vector<64x128xbf16>, vector<64x128xf32> -> vector<64x128xf32>
    %37 = arith.addf %36, %34 : vector<64x128xf32>
    %38 = vector.broadcast %30 : vector<1x128xf32> to vector<64x128xf32>
    %39 = arith.addf %37, %38 : vector<64x128xf32>
    %cst_24 = arith.constant 0.000000e+00 : f32
    %40 = vector.broadcast %cst_24 : f32 to vector<64x128xf32>
    %41 = arith.maximumf %39, %40 : vector<64x128xf32>
    %42 = vector.extract_strided_slice %41 {offsets = [0, 0], sizes = [64, 8], strides = [1, 1]} : vector<64x128xf32> to vector<64x8xf32>
    %c0_25 = arith.constant 0 : index
    %c0_26 = arith.constant 0 : index
    %43 = vector.load %arg9[%c0_25, %c0_26] : memref<64x8xf32, #tpu.memory_space<vmem>>, vector<64x8xf32>
    tpu.vector_store %arg9[%c0_25, %c0_26], %42 {strides = array<i32>} : memref<64x8xf32, #tpu.memory_space<vmem>>, vector<64x8xf32>,
    return
  }
}

</mosaic_0001>

<bundles_post_ra>
// kernel: forward.1
= control target key start
LH: loop header
LB: loop body
LE: loop exit
PB: predicated region body
PF: predicated region fallthrough
CT: control target
= control target key end

     0   :  { %14 = vsyncpa [#allocation3], 0  ;;  %s1144_s0 = inlined_call_operand.hbm [shape: bf16[64,64], index: 0, kind: input, shape index: {}]   ;;  %s1145_s1 = inlined_call_operand.vmem [shape: f32[64,16], index: 1, kind: input, shape index: {}]   ;;  %s1146_s2 = inlined_call_operand.vmem [shape: bf16[16,256], index: 2, kind: input, shape index: {}]   ;;  %s1147_s3 = inlined_call_operand.vmem [shape: f32[1,128], index: 3, kind: input, shape index: {}]   ;;  %s1148_s4 = inlined_call_operand.vmem [shape: bf16[128,128], index: 4, kind: input, shape index: {}]   ;;  %s1149_s5 = inlined_call_operand.vmem [shape: f32[1,128], index: 5, kind: input, shape index: {}]   ;;  %s1150_s6 = inlined_call_operand.vmem [shape: f32[1,128], index: 6, kind: input, shape index: {}]   ;;  %s1151_s7 = inlined_call_operand.hbm [shape: bf16[128,256], index: 7, kind: input, shape index: {}]   ;;  %s1152_s8 = inlined_call_operand.vmem [shape: f32[1,128], index: 8, kind: input, shape index: {}]   ;;  %s1153_s9 = inlined_call_operand.vmem [shape: f32[64,8], index: 9, kind: output, shape index: {}]  }
   0x1   :  { %s20_s11 = sshll.u32 %s1144_s0, 4  ;;  %s21_s11 = int_to_ptr.hbm [resolvable:$true] %s20_s11 }
   0x2   :  { %15 = vsyncpa [#allocation5], 0  ;;  %s882_s12 = smov [#allocation2]   ;;  %s45_s16 = sshll.u32 %s1151_s7, 4  ;;  %s46_s16 = int_to_ptr.hbm [resolvable:$true] %s45_s16 }
   0x3   :  { %s22_s13 = sshll.u32 %s882_s12, 4  ;;  %s883_s17 = smov 64   ;;  %s23_s13 = int_to_ptr.vmem [resolvable:$true] %s22_s13 }
   0x4   :  { %s884_s18 = smov 4   ;;  %s885_s19 = smov [#allocation4]  }
   0x5   :  { %28 = dma.hbm_to_vmem [thread:$0]  %s21_s11, 512, %s23_s13, [#allocation3], %s883_s17, %s883_s17, %s884_s18  }
   0x6   :  { %s47_s20 = sshll.u32 %s885_s19, 4  ;;  %s886_s21 = smov 128   ;;  %s48_s20 = int_to_ptr.vmem [resolvable:$true] %s47_s20 }
   0x7   :  { %s887_s22 = smov 8  }
   0x8   :  { %53 = dma.hbm_to_vmem [thread:$0]  %s46_s16, 2048, %s48_s20, [#allocation5], %s886_s21, %s886_s21, %s887_s22  }
   0x9   :  { %878 = dma.done.wait [#allocation3], 512  }
   0xa   :  { %879 = vsyncadd [#allocation3], 4294966784 }
   0xb   :  { %880 = dma.done.wait [#allocation5], 2048  }
   0xc   :  { %881 = vsyncadd [#allocation5], 4294965248  ;;  %v644_v0 = vld [vmem:[%s1146_s2] sm:$0xf]  ;;  %v787_v1 = vld [vmem:[%s1146_s2 + $0x4] sm:$0xf0] }
   0xd   :  { %v73_v2 = vld [vmem:[%s1145_s1] sm:$0xff]  ;;  %v645_v3 = vor.u32 %v787_v1, %v644_v0  ;;  %v74_v4 = vld [vmem:[%s1145_s1 + $0x8] sm:$0xff]  ;;  %vm98_vm0 = vcmask 130048   ;;  %v75_v6 = vld [vmem:[%s1145_s1 + $0x10] sm:$0xff]  ;;  %vm193_vm1 = vcmask 523264   ;;  %vm627_vm2 = vcmask 64512  }
   0xe   :  { %v84_v5 = vpack.c.bf16 %v74_v4, %v73_v2  ;;  %v76_v7 = vld [vmem:[%s1145_s1 + $0x18] sm:$0xff]  ;;  %v77_v9 = vld [vmem:[%s1145_s1 + $0x20] sm:$0xff]  ;;  %v78_v10 = vld [vmem:[%s1145_s1 + $0x28] sm:$0xff] }
   0xf   :  { %118 = vmatpush.bf16.msra.mxu0 %v645_v3  ;;  %v85_v8 = vpack.c.bf16 %v76_v7, %v75_v6  ;;  %v86_v11 = vpack.c.bf16 %v78_v10, %v77_v9  ;;  %v79_v12 = vld [vmem:[%s1145_s1 + $0x30] sm:$0xff]  ;;  %v80_v13 = vld [vmem:[%s1145_s1 + $0x38] sm:$0xff]  ;;  %v786_v20 = vld [vmem:[%s1146_s2 + $0x4] sm:$0xf] }
  0x10   :  { %v87_v14 = vpack.c.bf16 %v80_v13, %v79_v12  ;;  %v646_v21 = vld [vmem:[%s1146_s2 + $0x8] sm:$0xf0]  ;;  %v986_v30 = vld [vmem:[#allocation2] sm:$0xff]  ;;  %v795_v32 = vld [vmem:[%s1148_s4 + $0x38] sm:$0xff] }
  0x11   :  { %v649_v22 = vor.u32 %v786_v20, %v646_v21  ;;  %v991_v31 = vld [vmem:[#allocation2 + $0x8] sm:$0xff]  ;;  %v794_v33 = vld [vmem:[%s1148_s4 + $0x30] sm:$0xff]  ;;  %812 = vmatpush.bf16.msra.mxu3 %v795_v32  ;;  %v1006_v35 = vld [vmem:[#allocation2 + $0x18] sm:$0xff] }
  0x12   :  { %650 = vmatmul.msk.bf16.vlgmr.msra.gmra.mxu0 %vm98_vm0, %v84_v5  ;;  %v1002_v34 = vld [vmem:[#allocation2 + $0x10] sm:$0xff]  ;;  %v793_v36 = vld [vmem:[%s1148_s4 + $0x28] sm:$0xff]  ;;  %v792_v37 = vld [vmem:[%s1148_s4 + $0x20] sm:$0xff] }
  0x13   :  { %147 = vmatpush.bf16.msra.mxu1 %v649_v22  ;;  %324 = vmatpush.bf16.msrb.mxu0 %v795_v32  ;;  %v791_v38 = vld [vmem:[%s1148_s4 + $0x18] sm:$0xff]  ;;  %v790_v39 = vld [vmem:[%s1148_s4 + $0x10] sm:$0xff]  ;;  %v789_v40 = vld [vmem:[%s1148_s4 + $0x8] sm:$0xff] }
  0x14   :  { %v788_v41 = vld [vmem:[%s1148_s4] sm:$0xff] }
  0x15   :  { %813 = vmatpush.bf16.msra.mxu3 %v794_v33  ;;  %v826_v46 = vld [vmem:[%s1147_s3] ss:$0 sm:$0xff] }
  0x16   :  { %654 = vmatmul.msk.bf16.vlgmr.msra.gmra.mxu1 %vm98_vm0, %v84_v5 }
  0x17   :  { %325 = vmatpush.bf16.msrb.mxu0 %v794_v33 }
  0x19   :  { %814 = vmatpush.bf16.msra.mxu3 %v793_v36 }
  0x1b   :  { %326 = vmatpush.bf16.msrb.mxu0 %v793_v36 }
  0x1d   :  { %815 = vmatpush.bf16.msra.mxu3 %v792_v37 }
  0x1f   :  { %327 = vmatpush.bf16.msrb.mxu0 %v792_v37 }
  0x21   :  { %816 = vmatpush.bf16.msra.mxu3 %v791_v38 }
  0x22   :  { %651 = vmatmul.msk.bf16.gmra.mxu0 %vm98_vm0, %v85_v8 }
  0x23   :  { %328 = vmatpush.bf16.msrb.mxu0 %v791_v38 }
  0x25   :  { %817 = vmatpush.bf16.msra.mxu3 %v790_v39 }
  0x26   :  { %655 = vmatmul.msk.bf16.gmra.mxu1 %vm98_vm0, %v85_v8 }
  0x27   :  { %329 = vmatpush.bf16.msrb.mxu0 %v790_v39  ;;  %v772_v39 = vld [vmem:[#allocation4 + $0x70] sm:$0xf] }
  0x29   :  { %818 = vmatpush.bf16.msra.mxu3 %v789_v40 }
  0x2b   :  { %330 = vmatpush.bf16.msrb.mxu0 %v789_v40  ;;  %v811_v40 = vld [vmem:[#allocation4 + $0x74] sm:$0xf0] }
  0x2d   :  { %819 = vmatpush.bf16.msra.mxu3 %v788_v41 }
  0x2f   :  { %331 = vmatpush.bf16.msrb.mxu0 %v788_v41  ;;  %v810_v41 = vld [vmem:[#allocation4 + $0x74] sm:$0xf] }
  0x32   :  { %652 = vmatmul.msk.bf16.gmra.mxu0 %vm98_vm0, %v86_v11 }
  0x36   :  { %656 = vmatmul.msk.bf16.gmra.mxu1 %vm98_vm0, %v86_v11 }
  0x42   :  { %653 = vmatmul.msk.bf16.gmra.mxu0 %vm98_vm0, %v87_v14 }
  0x46   :  { %657 = vmatmul.msk.bf16.gmra.mxu1 %vm98_vm0, %v87_v14 }
  0x8f   :  { %v120_v15 = vpop.f32.mrf.mxu0 }
  0x93   :  { %v149_v42 = vpop.f32.mrf.mxu1 }
  0x97   :  { %v122_v16 = vpop.f32.mrf.mxu0 }
  0x98   :  { %v169_v29 = vpack.c.bf16 %v122_v16, %v120_v15 }
  0x9b   :  { %v151_v43 = vpop.f32.mrf.mxu1 }
  0x9f   :  { %v125_v17 = vpop.f32.mrf.mxu0 }
  0xa3   :  { %v154_v47 = vpop.f32.mrf.mxu1 }
  0xa7   :  { %v127_v18 = vpop.f32.mrf.mxu0 }
  0xa8   :  { %v170_v28 = vpack.c.bf16 %v127_v18, %v125_v17 }
  0xab   :  { %v156_v55 = vpop.f32.mrf.mxu1 }
  0xaf   :  { %v130_v19 = vpop.f32.mrf.mxu0 }
  0xb3   :  { %v159_v61 = vpop.f32.mrf.mxu1 }
  0xb7   :  { %v132_v23 = vpop.f32.mrf.mxu0 }
  0xb8   :  { %v171_v27 = vpack.c.bf16 %v132_v23, %v130_v19 }
  0xbb   :  { %v161_v3 = vpop.f32.mrf.mxu1 }
  0xbf   :  { %v135_v24 = vpop.f32.mrf.mxu0 }
  0xc3   :  { %v164_v11 = vpop.f32.mrf.mxu1 }
  0xc7   :  { %v137_v25 = vpop.f32.mrf.mxu0 }
  0xc8   :  { %v172_v26 = vpack.c.bf16 %v137_v25, %v135_v24 }
  0xca   :  { %210 = vmatpush.bf16.msra.mxu2 %v172_v26 }
  0xcb   :  { %v166_v15 = vpop.f32.mrf.mxu1 }
  0xce   :  { %211 = vmatpush.bf16.msra.mxu2 %v171_v27 }
  0xd2   :  { %212 = vmatpush.bf16.msra.mxu2 %v170_v28 }
  0xd6   :  { %213 = vmatpush.bf16.msra.mxu2 %v169_v29 }
  0xd9   :  { %674 = vmatmul.msk.bf16.vlgmr.msra.gmra.mxu2 %vm193_vm1, %v986_v30 }
  0xe9   :  { %675 = vmatmul.msk.bf16.gmra.mxu2 %vm193_vm1, %v991_v31 }
  0xf9   :  { %676 = vmatmul.msk.bf16.gmra.mxu2 %vm193_vm1, %v1002_v34 }
 0x109   :  { %677 = vmatmul.msk.bf16.gmra.mxu2 %vm193_vm1, %v1006_v35 }
 0x15c   :  { %v215_v44 = vpop.f32.mrf.mxu2 }
 0x15d   :  { %v216_v45 = vadd.f32 %v215_v44, %v149_v42  ;;  %v773_v42 = vor.u32 %v811_v40, %v772_v39  ;;  %v764_v44 = vld [vmem:[#allocation4 + $0x60] sm:$0xf]  ;;  %v796_v39 = vld [vmem:[#allocation4 + $0x4] sm:$0xf] }
 0x15f   :  { %v1031_v49 = vadd.f32 %v826_v46, %v216_v45  ;;  %v809_v45 = vld [vmem:[#allocation4 + $0x64] sm:$0xf0]  ;;  %517 = vmatpush.bf16.msrb.mxu1 %v773_v42 }
 0x161   :  { %v246_v52 = vmax.f32 %v1031_v49, 0.0 }
 0x164   :  { %v217_v48 = vpop.f32.mrf.mxu2 }
 0x165   :  { %v218_v50 = vadd.f32 %v217_v48, %v151_v43  ;;  %v774_v43 = vld [vmem:[#allocation4 + $0x78] sm:$0xf0]  ;;  %v766_v48 = vld [vmem:[#allocation4 + $0x68] sm:$0xf0] }
 0x167   :  { %v1033_v51 = vadd.f32 %v826_v46, %v218_v50  ;;  %v765_v50 = vor.u32 %v809_v45, %v764_v44 }
 0x169   :  { %v247_v53 = vmax.f32 %v1033_v51, 0.0  ;;  %518 = vmatpush.bf16.msrb.mxu1 %v765_v50 }
 0x16b   :  { %v272_v54 = vpack.c.bf16 %v247_v53, %v246_v52 }
 0x16c   :  { %v220_v56 = vpop.f32.mrf.mxu2 }
 0x16d   :  { %332 = vmatmul.bf16.vlgmr.msrb.gmra.mxu0 %v272_v54  ;;  %v221_v57 = vadd.f32 %v220_v56, %v154_v47  ;;  %v808_v47 = vld [vmem:[#allocation4 + $0x64] sm:$0xf]  ;;  %v807_v56 = vld [vmem:[#allocation4 + $0x54] sm:$0xf0] }
 0x16e   :  { %v769_v54 = vor.u32 %v808_v47, %v766_v48  ;;  %v828_v47 = vld [vmem:[%s1150_s6] ss:$0 sm:$0xff] }
 0x16f   :  { %v1041_v59 = vadd.f32 %v826_v46, %v221_v57  ;;  %v806_v57 = vld [vmem:[#allocation4 + $0x54] sm:$0xf] }
 0x171   :  { %v248_v63 = vmax.f32 %v1041_v59, 0.0 }
 0x174   :  { %v222_v58 = vpop.f32.mrf.mxu2 }
 0x175   :  { %v223_v60 = vadd.f32 %v222_v58, %v156_v55  ;;  %v756_v55 = vld [vmem:[#allocation4 + $0x50] sm:$0xf]  ;;  %v758_v58 = vld [vmem:[#allocation4 + $0x58] sm:$0xf0] }
 0x177   :  { %v1043_v62 = vadd.f32 %v826_v46, %v223_v60  ;;  %v757_v60 = vor.u32 %v807_v56, %v756_v55 }
 0x179   :  { %v249_v0 = vmax.f32 %v1043_v62, 0.0  ;;  %519 = vmatpush.bf16.msrb.mxu1 %v757_v60 }
 0x17b   :  { %v273_v1 = vpack.c.bf16 %v249_v0, %v248_v63 }
 0x17c   :  { %v225_v2 = vpop.f32.mrf.mxu2 }
 0x17d   :  { %337 = vmatmul.bf16.vlgmr.msra.gmra.mxu3 %v273_v1  ;;  %v226_v4 = vadd.f32 %v225_v2, %v159_v61  ;;  %v761_v61 = vor.u32 %v806_v57, %v758_v58  ;;  %v748_v1 = vld [vmem:[#allocation4 + $0x40] sm:$0xf]  ;;  %v805_v2 = vld [vmem:[#allocation4 + $0x44] sm:$0xf0] }
 0x17f   :  { %v1051_v6 = vadd.f32 %v826_v46, %v226_v4  ;;  %v750_v4 = vld [vmem:[#allocation4 + $0x48] sm:$0xf0] }
 0x181   :  { %v250_v9 = vmax.f32 %v1051_v6, 0.0 }
 0x184   :  { %v227_v5 = vpop.f32.mrf.mxu2 }
 0x185   :  { %v228_v7 = vadd.f32 %v227_v5, %v161_v3  ;;  %v804_v3 = vld [vmem:[#allocation4 + $0x44] sm:$0xf]  ;;  %v749_v5 = vor.u32 %v805_v2, %v748_v1 }
 0x187   :  { %v1053_v8 = vadd.f32 %v826_v46, %v228_v7  ;;  %v753_v7 = vor.u32 %v804_v3, %v750_v4  ;;  %520 = vmatpush.bf16.msrb.mxu1 %v749_v5 }
 0x189   :  { %v251_v10 = vmax.f32 %v1053_v8, 0.0 }
 0x18b   :  { %v274_v12 = vpack.c.bf16 %v251_v10, %v250_v9 }
 0x18c   :  { %v230_v13 = vpop.f32.mrf.mxu2 }
 0x18d   :  { %342 = vmatmul.bf16.gmra.mxu3 %v274_v12  ;;  %v231_v14 = vadd.f32 %v230_v13, %v164_v11  ;;  %v740_v11 = vld [vmem:[#allocation4 + $0x30] sm:$0xf]  ;;  %v803_v12 = vld [vmem:[#allocation4 + $0x34] sm:$0xf0]  ;;  %v802_v13 = vld [vmem:[#allocation4 + $0x34] sm:$0xf] }
 0x18f   :  { %v1061_v17 = vadd.f32 %v826_v46, %v231_v14  ;;  %v741_v14 = vor.u32 %v803_v12, %v740_v11 }
 0x191   :  { %v252_v20 = vmax.f32 %v1061_v17, 0.0  ;;  %521 = vmatpush.bf16.msrb.mxu1 %v741_v14 }
 0x194   :  { %v232_v16 = vpop.f32.mrf.mxu2 }
 0x195   :  { %v233_v18 = vadd.f32 %v232_v16, %v166_v15  ;;  %v742_v15 = vld [vmem:[#allocation4 + $0x38] sm:$0xf0] }
 0x196   :  { %v745_v16 = vor.u32 %v802_v13, %v742_v15 }
 0x197   :  { %v1063_v19 = vadd.f32 %v826_v46, %v233_v18  ;;  %v777_v46 = vor.u32 %v810_v41, %v774_v43  ;;  %v732_v18 = vld [vmem:[#allocation4 + $0x20] sm:$0xf]  ;;  %v718_v41 = vld [vmem:[#allocation4 + $0x8] sm:$0xf0] }
 0x198   :  { %v721_v42 = vor.u32 %v796_v39, %v718_v41  ;;  %v827_v43 = vld [vmem:[%s1149_s5] ss:$0 sm:$0xff] }
 0x199   :  { %v253_v21 = vmax.f32 %v1063_v19, 0.0  ;;  %546 = vmatpush.bf16.msrb.mxu2 %v777_v46  ;;  %v356_v45 = vmul.f32 %v827_v43, %v246_v52  ;;  %v357_v48 = vmul.f32 %v827_v43, %v247_v53  ;;  %v358_v49 = vmul.f32 %v827_v43, %v248_v63 }
 0x19a   :  { %v359_v1 = vmul.f32 %v827_v43, %v249_v0  ;;  %v360_v12 = vmul.f32 %v827_v43, %v250_v9  ;;  %v361_v59 = vmul.f32 %v827_v43, %v251_v10 }
 0x19b   :  { %v275_v22 = vpack.c.bf16 %v253_v21, %v252_v20  ;;  %v363_v6 = vmul.f32 %v827_v43, %v253_v21 }
 0x19d   :  { %347 = vmatmul.bf16.gmra.mxu3 %v275_v22  ;;  %547 = vmatpush.bf16.msrb.mxu2 %v769_v54  ;;  %v801_v22 = vld [vmem:[#allocation4 + $0x24] sm:$0xf0] }
 0x1a1   :  { %548 = vmatpush.bf16.msrb.mxu2 %v761_v61 }
 0x1a5   :  { %549 = vmatpush.bf16.msrb.mxu2 %v753_v7 }
 0x1a9   :  { %550 = vmatpush.bf16.msrb.mxu2 %v745_v16 }
 0x1ea   :  { %v333_v28 = vpop.f32.mrf.mxu0 }
 0x1f2   :  { %v335_v37 = vpop.f32.mrf.mxu0 }
 0x1f3   :  { %v364_v38 = vpack.c.bf16 %v335_v37, %v333_v28  ;;  %v799_v28 = vld [vmem:[#allocation4 + $0x14] sm:$0xf0]  ;;  %v716_v37 = vld [vmem:[#allocation4] sm:$0xf] }
 0x200   :  { %v338_v23 = vpop.f32.mrf.mxu3 }
 0x208   :  { %v340_v24 = vpop.f32.mrf.mxu3 }
 0x209   :  { %v365_v36 = vpack.c.bf16 %v340_v24, %v338_v23  ;;  %v800_v23 = vld [vmem:[#allocation4 + $0x24] sm:$0xf]  ;;  %v733_v24 = vor.u32 %v801_v22, %v732_v18 }
 0x20b   :  { %522 = vmatpush.bf16.msrb.mxu1 %v733_v24 }
 0x210   :  { %v343_v25 = vpop.f32.mrf.mxu3 }
 0x218   :  { %v345_v26 = vpop.f32.mrf.mxu3 }
 0x219   :  { %v366_v33 = vpack.c.bf16 %v345_v26, %v343_v25  ;;  %v734_v25 = vld [vmem:[#allocation4 + $0x28] sm:$0xf0] }
 0x21a   :  { %v737_v26 = vor.u32 %v800_v23, %v734_v25  ;;  %v362_v23 = vmul.f32 %v827_v43, %v252_v20  ;;  %v829_v43 = vld [vmem:[%s1152_s8] ss:$0 sm:$0xff] }
 0x21c   :  { %551 = vmatpush.bf16.msrb.mxu2 %v737_v26 }
 0x220   :  { %v348_v27 = vpop.f32.mrf.mxu3 }
 0x228   :  { %v350_v29 = vpop.f32.mrf.mxu3 }
 0x229   :  { %v367_v32 = vpack.c.bf16 %v350_v29, %v348_v27  ;;  %v724_v27 = vld [vmem:[#allocation4 + $0x10] sm:$0xf]  ;;  %v798_v29 = vld [vmem:[#allocation4 + $0x14] sm:$0xf] }
 0x22b   :  { %372 = vmatpush.bf16.msra.mxu0 %v367_v32  ;;  %v725_v32 = vor.u32 %v799_v28, %v724_v27 }
 0x22d   :  { %523 = vmatpush.bf16.msrb.mxu1 %v725_v32 }
 0x22f   :  { %373 = vmatpush.bf16.msra.mxu0 %v366_v33  ;;  %v726_v33 = vld [vmem:[#allocation4 + $0x18] sm:$0xf0] }
 0x233   :  { %374 = vmatpush.bf16.msra.mxu0 %v365_v36  ;;  %v729_v36 = vor.u32 %v798_v29, %v726_v33 }
 0x235   :  { %552 = vmatpush.bf16.msrb.mxu2 %v729_v36 }
 0x237   :  { %375 = vmatpush.bf16.msra.mxu0 %v364_v38  ;;  %v797_v38 = vld [vmem:[#allocation4 + $0x4] sm:$0xf0] }
 0x238   :  { %v717_v40 = vor.u32 %v797_v38, %v716_v37 }
 0x239   :  { %553 = vmatpush.bf16.msrb.mxu2 %v721_v42 }
 0x23a   :  { %710 = vmatmul.msk.bf16.vlgmr.msra.gmra.mxu0 %vm193_vm1, %v986_v30  ;;  %524 = vmatpush.bf16.msrb.mxu1 %v717_v40 }
 0x24a   :  { %711 = vmatmul.msk.bf16.gmra.mxu0 %vm193_vm1, %v991_v31 }
 0x25a   :  { %712 = vmatmul.msk.bf16.gmra.mxu0 %vm193_vm1, %v1002_v34 }
 0x26a   :  { %713 = vmatmul.msk.bf16.gmra.mxu0 %vm193_vm1, %v1006_v35 }
 0x2b7   :  { %v377_v44 = vpop.f32.mrf.mxu0 }
 0x2b8   :  { %v378_v46 = vadd.f32 %v377_v44, %v356_v45 }
 0x2ba   :  { %v400_v54 = vadd.f32 %v828_v47, %v378_v46 }
 0x2bc   :  { %v408_v57 = vmax.f32 %v400_v54, 0.0 }
 0x2bf   :  { %v379_v50 = vpop.f32.mrf.mxu0 }
 0x2c0   :  { %v380_v55 = vadd.f32 %v379_v50, %v357_v48 }
 0x2c2   :  { %v401_v56 = vadd.f32 %v828_v47, %v380_v55 }
 0x2c4   :  { %v409_v58 = vmax.f32 %v401_v56, 0.0 }
 0x2c6   :  { %v433_v60 = vpack.c.bf16 %v409_v58, %v408_v57 }
 0x2c7   :  { %v382_v61 = vpop.f32.mrf.mxu0 }
 0x2c8   :  { %525 = vmatmul.bf16.vlgmr.msrb.gmra.mxu1 %v433_v60  ;;  %554 = vmatmul.bf16.vlgmr.msrb.gmra.mxu2 %v433_v60  ;;  %v383_v52 = vadd.f32 %v382_v61, %v358_v49 }
 0x2ca   :  { %v402_v51 = vadd.f32 %v828_v47, %v383_v52 }
 0x2cc   :  { %v410_v4 = vmax.f32 %v402_v51, 0.0 }
 0x2cf   :  { %v384_v2 = vpop.f32.mrf.mxu0 }
 0x2d0   :  { %v385_v53 = vadd.f32 %v384_v2, %v359_v1 }
 0x2d2   :  { %v403_v3 = vadd.f32 %v828_v47, %v385_v53 }
 0x2d4   :  { %v411_v5 = vmax.f32 %v403_v3, 0.0 }
 0x2d6   :  { %v434_v7 = vpack.c.bf16 %v411_v5, %v410_v4 }
 0x2d7   :  { %v387_v11 = vpop.f32.mrf.mxu0 }
 0x2d8   :  { %530 = vmatmul.bf16.gmra.mxu1 %v434_v7  ;;  %559 = vmatmul.bf16.gmra.mxu2 %v434_v7  ;;  %v388_v13 = vadd.f32 %v387_v11, %v360_v12 }
 0x2da   :  { %v404_v62 = vadd.f32 %v828_v47, %v388_v13 }
 0x2dc   :  { %v412_v15 = vmax.f32 %v404_v62, 0.0 }
 0x2df   :  { %v389_v63 = vpop.f32.mrf.mxu0 }
 0x2e0   :  { %v390_v0 = vadd.f32 %v389_v63, %v361_v59 }
 0x2e2   :  { %v405_v14 = vadd.f32 %v828_v47, %v390_v0 }
 0x2e4   :  { %v413_v16 = vmax.f32 %v405_v14, 0.0 }
 0x2e6   :  { %v435_v18 = vpack.c.bf16 %v413_v16, %v412_v15 }
 0x2e7   :  { %v392_v22 = vpop.f32.mrf.mxu0 }
 0x2e8   :  { %535 = vmatmul.bf16.gmra.mxu1 %v435_v18  ;;  %564 = vmatmul.bf16.gmra.mxu2 %v435_v18  ;;  %v393_v24 = vadd.f32 %v392_v22, %v362_v23 }
 0x2ea   :  { %v406_v8 = vadd.f32 %v828_v47, %v393_v24 }
 0x2ec   :  { %v414_v26 = vmax.f32 %v406_v8, 0.0 }
 0x2ef   :  { %v394_v9 = vpop.f32.mrf.mxu0 }
 0x2f0   :  { %v395_v10 = vadd.f32 %v394_v9, %v363_v6 }
 0x2f2   :  { %v407_v25 = vadd.f32 %v828_v47, %v395_v10 }
 0x2f4   :  { %v415_v27 = vmax.f32 %v407_v25, 0.0 }
 0x2f6   :  { %v436_v28 = vpack.c.bf16 %v415_v27, %v414_v26 }
 0x2f8   :  { %540 = vmatmul.bf16.gmra.mxu1 %v436_v28  ;;  %569 = vmatmul.bf16.gmra.mxu2 %v436_v28 }
 0x345   :  { %v526_v29 = vpop.f32.mrf.mxu1 }
 0x34b   :  { %v555_v41 = vpop.f32.mrf.mxu2 }
 0x34d   :  { %v528_v32 = vpop.f32.mrf.mxu1 }
 0x34e   :  { %v575_v40 = vpack.c.bf16 %v528_v32, %v526_v29 }
 0x353   :  { %v557_v42 = vpop.f32.mrf.mxu2 }
 0x355   :  { %v531_v33 = vpop.f32.mrf.mxu1 }
 0x35b   :  { %v560_v47 = vpop.f32.mrf.mxu2 }
 0x35d   :  { %v533_v36 = vpop.f32.mrf.mxu1 }
 0x35e   :  { %v576_v21 = vpack.c.bf16 %v533_v36, %v531_v33 }
 0x363   :  { %v562_v50 = vpop.f32.mrf.mxu2 }
 0x365   :  { %v536_v37 = vpop.f32.mrf.mxu1 }
 0x36b   :  { %v565_v61 = vpop.f32.mrf.mxu2 }
 0x36d   :  { %v538_v17 = vpop.f32.mrf.mxu1 }
 0x36e   :  { %v577_v19 = vpack.c.bf16 %v538_v17, %v536_v37 }
 0x373   :  { %v567_v53 = vpop.f32.mrf.mxu2 }
 0x375   :  { %v541_v20 = vpop.f32.mrf.mxu1 }
 0x37b   :  { %v570_v12 = vpop.f32.mrf.mxu2 }
 0x37d   :  { %v543_v38 = vpop.f32.mrf.mxu1 }
 0x37e   :  { %v578_v39 = vpack.c.bf16 %v543_v38, %v541_v20 }
 0x380   :  { %583 = vmatpush.bf16.msrb.mxu3 %v578_v39 }
 0x383   :  { %v572_v0 = vpop.f32.mrf.mxu2 }
 0x384   :  { %584 = vmatpush.bf16.msrb.mxu3 %v577_v19 }
 0x388   :  { %585 = vmatpush.bf16.msrb.mxu3 %v576_v21 }
 0x38c   :  { %586 = vmatpush.bf16.msrb.mxu3 %v575_v40 }
 0x38f   :  { %778 = vmatmul.msk.bf16.vlgmr.msrb.gmra.mxu3 %vm193_vm1, %v986_v30 }
 0x39f   :  { %779 = vmatmul.msk.bf16.gmra.mxu3 %vm193_vm1, %v991_v31 }
 0x3af   :  { %780 = vmatmul.msk.bf16.gmra.mxu3 %vm193_vm1, %v1002_v34 }
 0x3bf   :  { %781 = vmatmul.msk.bf16.gmra.mxu3 %vm193_vm1, %v1006_v35 }
 0x412   :  { %v588_v44 = vpop.f32.mrf.mxu3 }
 0x413   :  { %v589_v45 = vadd.f32 %v588_v44, %v555_v41 }
 0x415   :  { %v611_v46 = vadd.f32 %v829_v43, %v589_v45 }
 0x417   :  { %v619_v30 = vmax.f32 %v611_v46, 0.0 }
 0x419   :  { %628 = vst.msk [vmem:[%s1153_s9] sm:$0xff] %vm627_vm2, %v619_v30 }
 0x41a   :  { %v590_v31 = vpop.f32.mrf.mxu3 }
 0x41b   :  { %v591_v34 = vadd.f32 %v590_v31, %v557_v42 }
 0x41d   :  { %v612_v35 = vadd.f32 %v829_v43, %v591_v34 }
 0x41f   :  { %v620_v48 = vmax.f32 %v612_v35, 0.0 }
 0x421   :  { %629 = vst.msk [vmem:[%s1153_s9 + $0x8] sm:$0xff] %vm627_vm2, %v620_v48 }
 0x422   :  { %v593_v54 = vpop.f32.mrf.mxu3 }
 0x423   :  { %v594_v55 = vadd.f32 %v593_v54, %v560_v47 }
 0x425   :  { %v613_v56 = vadd.f32 %v829_v43, %v594_v55 }
 0x427   :  { %v621_v57 = vmax.f32 %v613_v56, 0.0 }
 0x429   :  { %630 = vst.msk [vmem:[%s1153_s9 + $0x10] sm:$0xff] %vm627_vm2, %v621_v57 }
 0x42a   :  { %v595_v58 = vpop.f32.mrf.mxu3 }
 0x42b   :  { %v596_v60 = vadd.f32 %v595_v58, %v562_v50 }
 0x42d   :  { %v614_v49 = vadd.f32 %v829_v43, %v596_v60 }
 0x42f   :  { %v622_v52 = vmax.f32 %v614_v49, 0.0 }
 0x431   :  { %631 = vst.msk [vmem:[%s1153_s9 + $0x18] sm:$0xff] %vm627_vm2, %v622_v52 }
 0x432   :  { %v598_v1 = vpop.f32.mrf.mxu3 }
 0x433   :  { %v599_v2 = vadd.f32 %v598_v1, %v565_v61 }
 0x435   :  { %v615_v51 = vadd.f32 %v829_v43, %v599_v2 }
 0x437   :  { %v623_v3 = vmax.f32 %v615_v51, 0.0 }
 0x439   :  { %632 = vst.msk [vmem:[%s1153_s9 + $0x20] sm:$0xff] %vm627_vm2, %v623_v3 }
 0x43a   :  { %v600_v4 = vpop.f32.mrf.mxu3 }
 0x43b   :  { %v601_v5 = vadd.f32 %v600_v4, %v567_v53 }
 0x43d   :  { %v616_v7 = vadd.f32 %v829_v43, %v601_v5 }
 0x43f   :  { %v624_v11 = vmax.f32 %v616_v7, 0.0 }
 0x441   :  { %633 = vst.msk [vmem:[%s1153_s9 + $0x28] sm:$0xff] %vm627_vm2, %v624_v11 }
 0x442   :  { %v603_v13 = vpop.f32.mrf.mxu3 }
 0x443   :  { %v604_v59 = vadd.f32 %v603_v13, %v570_v12 }
 0x445   :  { %v617_v63 = vadd.f32 %v829_v43, %v604_v59 }
 0x447   :  { %v625_v62 = vmax.f32 %v617_v63, 0.0 }
 0x449   :  { %634 = vst.msk [vmem:[%s1153_s9 + $0x30] sm:$0xff] %vm627_vm2, %v625_v62 }
 0x44a   :  { %v605_v14 = vpop.f32.mrf.mxu3 }
 0x44b   :  { %v606_v15 = vadd.f32 %v605_v14, %v572_v0 }
 0x44d   :  { %v618_v16 = vadd.f32 %v829_v43, %v606_v15 }
 0x44f   :  { %v626_v18 = vmax.f32 %v618_v16, 0.0 }
 0x451   :  { %635 = vst.msk [vmem:[%s1153_s9 + $0x38] sm:$0xff] %vm627_vm2, %v626_v18 }
 0x452   :  { %640 = vsyncpa [#allocation3], 1 }
 0x453   :  { %641 = vsyncpa [#allocation5], 1 }

</bundles_post_ra>
